<compile_context>
chip_gen: v7x
topology: tpu7x:2x2x1
jax: 0.10.0
libtpu: 0.0.40
codegen_flags: <defaults>
</compile_context>

<pallas_src>
import functools
import numpy as np
import jax
import jax.numpy as jnp
from jax import lax
from jax.experimental import pallas as pl
from jax.experimental.pallas import tpu as pltpu

# HBM-facing dtypes.  float32 == bit-level parity with the PyTorch reference.
# Set ACT_DTYPE / ATTN_DTYPE to jnp.bfloat16 on v6e/v7x for ~2x on the memory-bound
# phases (softmax/LayerNorm element-wise math stays f32 inside the kernels).
ACT_DTYPE = jnp.float32
ATTN_DTYPE = jnp.float32   # the O(L^2) attention-matrix writeback (largest store stream)


# --------------------------- VMEM / tile sizing -----------------------------

def _tpu_vmem_capacity_bytes():
    try:
        return int(pltpu.get_tpu_info().vmem_capacity_bytes)
    except Exception:
        return 64 * 1024 * 1024   # conservative fallback (v7x per-core VMEM)


_VMEM_CAPACITY = _tpu_vmem_capacity_bytes()
_VMEM_BUDGET = int(_VMEM_CAPACITY * 0.4)                        # for picking block sizes
_VMEM_LIMIT = int(min(_VMEM_CAPACITY * 3 // 4, 96 * 2 ** 20))   # scoped limit (> 16 MiB v5e default)


def _compiler_params(semantics):
    return pltpu.CompilerParams(dimension_semantics=semantics,
                                vmem_limit_bytes=_VMEM_LIMIT)


def _choose_row_tile(n_rows, row_bytes, resident_bytes, budget_bytes, cap=2048):
    """Largest multiple-of-8 row tile whose double-buffered blocks fit the VMEM budget,
    capped near ceil(n_rows/2) so the 'parallel' row axis has >= 2 grid steps (keeps both
    v7x TensorCores busy; measured neutral on single-TC v5e/v6e)."""
    if n_rows <= 8:
        return max(int(n_rows), 1)
    avail = max(budget_bytes - resident_bytes, 8 * row_bytes)
    rt = min(cap, (avail // max(row_bytes, 1)) // 8 * 8)
    rt = max(int(rt), 8)
    half = 8 * ((n_rows + 15) // 16)           # ~ceil(n/2) rounded up to a multiple of 8
    return int(min(rt, max(8, half)))


def _choose_attn_tiles(BH, Lq, Lk, Dk, Dv, itemsize, budget_bytes):
    """(bh, tq) tile sizes for the attention kernel, derived from the VMEM budget."""
    tq = Lq if Lq <= 256 else 256              # multiple of 8 or the full (small) Lq

    def slice_bytes(t):
        # q/k/v/out/attn blocks (double-buffered) + f32 score scratch, per bh-slice
        return 2 * itemsize * (t * Dk + Lk * Dk + Lk * Dv + t * Dv + t * Lk) + 8 * t * Lk

    while tq > 8 and slice_bytes(tq) > budget_bytes:
        tq = max(8, tq // 2)
    bh = max(1, min(int(BH), int(budget_bytes // max(slice_bytes(tq), 1))))
    if BH > 1:
        bh = min(bh, (BH + 1) // 2)            # >= 2 'parallel' steps for v7x's 2 TCs
    return int(bh), int(tq)


# ----------------------------- Pallas kernels ------------------------------

def _qkv_proj_kernel(xq_ref, xk_ref, xv_ref, wq_ref, wk_ref, wv_ref,
                     bq_ref, bk_ref, bv_ref, oq_ref, ok_ref, ov_ref):
    # One row tile of the q/k/v activations projected against all three (pre-transposed,
    # VMEM-resident) weights in a single pipeline.  jnp.dot contracts x's last dim against
    # the (d_model, d_out) weight's first dim -> canonical MXU orientation, no transpose.
    def proj(x_ref, w_ref, b_ref, o_ref):
        y = jnp.dot(x_ref[...], w_ref[...], preferred_element_type=jnp.float32)
        o_ref[...] = (y + b_ref[...]).astype(o_ref.dtype)

    proj(xq_ref, wq_ref, bq_ref, oq_ref)
    proj(xk_ref, wk_ref, bk_ref, ok_ref)
    proj(xv_ref, wv_ref, bv_ref, ov_ref)


def pallas_qkv_projection(xq, xk, xv, wq, bq, wk, bk, wv, bv):
    """Fused Q/K/V projections (one pallas_call). x*: (N, d_model); w*: PyTorch (d_out, d_in)."""
    N, d_model = xq.shape
    dq, dk_, dv = wq.shape[0], wk.shape[0], wv.shape[0]
    itemsize = jnp.dtype(ACT_DTYPE).itemsize
    row_bytes = 2 * itemsize * (3 * d_model + dq + dk_ + dv)              # dbl-buffered x/y tiles
    resident = 2 * 4 * (d_model * (dq + dk_ + dv) + dq + dk_ + dv)        # weights + biases
    rt = _choose_row_tile(N, row_bytes, resident, _VMEM_BUDGET)
    grid = (pl.cdiv(N, rt),)

    cost = pl.CostEstimate(
        flops=int(2 * N * d_model * (dq + dk_ + dv)),
        transcendentals=0,
        bytes_accessed=int(itemsize * N * (3 * d_model + dq + dk_ + dv)
                           + 4 * (d_model + 1) * (dq + dk_ + dv)))

    act_spec = pl.BlockSpec((rt, d_model), lambda i: (i, 0))              # row-tiled activations
    def w_spec(dout):  return pl.BlockSpec((d_model, dout), lambda i: (0, 0))   # VMEM-resident
    def b_spec(dout):  return pl.BlockSpec((1, dout), lambda i: (0, 0))         # VMEM-resident
    def o_spec(dout):  return pl.BlockSpec((rt, dout), lambda i: (i, 0))

    return pl.pallas_call(
        _qkv_proj_kernel,
        out_shape=(jax.ShapeDtypeStruct((N, dq), ACT_DTYPE),
                   jax.ShapeDtypeStruct((N, dk_), ACT_DTYPE),
                   jax.ShapeDtypeStruct((N, dv), ACT_DTYPE)),
        grid=grid,
        in_specs=[act_spec, act_spec, act_spec,
                  w_spec(dq), w_spec(dk_), w_spec(dv),
                  b_spec(dq), b_spec(dk_), b_spec(dv)],
        out_specs=(o_spec(dq), o_spec(dk_), o_spec(dv)),
        compiler_params=_compiler_params(("parallel",)),
        cost_estimate=cost,
    )(xq.astype(ACT_DTYPE), xk.astype(ACT_DTYPE), xv.astype(ACT_DTYPE),
      wq.T.astype(ACT_DTYPE), wk.T.astype(ACT_DTYPE), wv.T.astype(ACT_DTYPE),
      bq.reshape(1, -1).astype(jnp.float32),
      bk.reshape(1, -1).astype(jnp.float32),
      bv.reshape(1, -1).astype(jnp.float32))


def _linear_kernel(x_ref, w_ref, b_ref, o_ref):
    y = jnp.dot(x_ref[...], w_ref[...], preferred_element_type=jnp.float32)
    o_ref[...] = (y + b_ref[...]).astype(o_ref.dtype)


def pallas_linear(x, w, b):
    """y = x @ w.T + b (PyTorch Linear). Fallback when q/k/v sequence lengths differ."""
    N, d_in = x.shape
    d_out = w.shape[0]
    itemsize = jnp.dtype(ACT_DTYPE).itemsize
    row_bytes = 2 * itemsize * (d_in + d_out)
    resident = 2 * 4 * (d_in * d_out + d_out)
    rt = _choose_row_tile(N, row_bytes, resident, _VMEM_BUDGET)
    grid = (pl.cdiv(N, rt),)
    cost = pl.CostEstimate(
        flops=int(2 * N * d_in * d_out), transcendentals=0,
        bytes_accessed=int(itemsize * N * (d_in + d_out) + 4 * (d_in * d_out + d_out)))
    return pl.pallas_call(
        _linear_kernel,
        out_shape=jax.ShapeDtypeStruct((N, d_out), ACT_DTYPE),
        grid=grid,
        in_specs=[
            pl.BlockSpec((rt, d_in), lambda i: (i, 0)),
            pl.BlockSpec((d_in, d_out), lambda i: (0, 0)),    # w^T: VMEM-resident
            pl.BlockSpec((1, d_out), lambda i: (0, 0)),
        ],
        out_specs=pl.BlockSpec((rt, d_out), lambda i: (i, 0)),
        compiler_params=_compiler_params(("parallel",)),
        cost_estimate=cost,
    )(x.astype(ACT_DTYPE), w.T.astype(ACT_DTYPE), b.reshape(1, -1).astype(jnp.float32))


def _attn_kernel(q_ref, k_ref, v_ref, o_ref, a_ref, *, inv_temperature):
    # Refs carry a (bh, tq, Dk) / (bh, Lk, Dk) / (bh, Lk, Dv) tile of (head*batch) slices.
    # Fold 1/temperature into q: O(tq*Dk) multiplies instead of O(tq*Lk) divides.
    q = q_ref[...] * inv_temperature
    s = jnp.einsum("bqd,bkd->bqk", q, k_ref[...], preferred_element_type=jnp.float32)
    # softmax over the last dim (PyTorch Softmax(dim=2) on (n_head*b, len_q, len_k))
    s = s - jnp.max(s, axis=-1, keepdims=True)
    e = jnp.exp(s)
    denom = jnp.sum(e, axis=-1, keepdims=True)
    # EUP approx reciprocal (per-row only); use approx=False for bit-exact softmax parity.
    attn = e * pl.reciprocal(denom, approx=True)
    a_ref[...] = attn.astype(a_ref.dtype)
    o_ref[...] = jnp.einsum("bqk,bkd->bqd", attn.astype(v_ref.dtype), v_ref[...],
                            preferred_element_type=jnp.float32).astype(o_ref.dtype)


def pallas_sdp_attention(q, k, v, temperature):
    """q:(BH, Lq, Dk), k:(BH, Lk, Dk), v:(BH, Lk, Dv) -> (output, attn)."""
    BH, Lq, Dk = q.shape
    _, Lk, _ = k.shape
    Dv = v.shape[-1]
    itemsize = jnp.dtype(ACT_DTYPE).itemsize
    bh, tq = _choose_attn_tiles(BH, Lq, Lk, Dk, Dv, itemsize, _VMEM_BUDGET)
    grid = (pl.cdiv(BH, bh), pl.cdiv(Lq, tq))
    kernel = functools.partial(_attn_kernel, inv_temperature=float(1.0 / temperature))
    cost = pl.CostEstimate(
        flops=int(BH * (2 * Lq * Lk * Dk + 2 * Lq * Lk * Dv + 4 * Lq * Lk)),
        transcendentals=int(BH * Lq * Lk),
        bytes_accessed=int(itemsize * BH * (Lq * Dk + Lk * Dk + Lk * Dv + Lq * Dv)
                           + jnp.dtype(ATTN_DTYPE).itemsize * BH * Lq * Lk))
    return pl.pallas_call(
        kernel,
        out_shape=(jax.ShapeDtypeStruct((BH, Lq, Dv), ACT_DTYPE),
                   jax.ShapeDtypeStruct((BH, Lq, Lk), ATTN_DTYPE)),
        grid=grid,
        in_specs=[
            pl.BlockSpec((bh, tq, Dk), lambda i, j: (i, j, 0)),
            pl.BlockSpec((bh, Lk, Dk), lambda i, j: (i, 0, 0)),   # K resident across q-tiles
            pl.BlockSpec((bh, Lk, Dv), lambda i, j: (i, 0, 0)),   # V resident across q-tiles
        ],
        out_specs=(
            pl.BlockSpec((bh, tq, Dv), lambda i, j: (i, j, 0)),
            pl.BlockSpec((bh, tq, Lk), lambda i, j: (i, j, 0)),
        ),
        compiler_params=_compiler_params(("parallel", "parallel")),
        cost_estimate=cost,
    )(q, k, v)


def _fc_res_ln_kernel(x_ref, w_ref, b_ref, res_ref, g_ref, beta_ref, o_ref):
    # fc (dropout = eval-mode identity) + residual add + LayerNorm over last dim (eps=1e-5)
    y = jnp.dot(x_ref[...], w_ref[...], preferred_element_type=jnp.float32) + b_ref[...]
    z = y + res_ref[...].astype(jnp.float32)
    mean = jnp.mean(z, axis=-1, keepdims=True)
    var = jnp.mean((z - mean) ** 2, axis=-1, keepdims=True)
    zn = (z - mean) * lax.rsqrt(var + 1e-5)
    o_ref[...] = (zn * g_ref[...] + beta_ref[...]).astype(o_ref.dtype)


def pallas_fc_residual_layernorm(x, w, b, residual, gamma, beta):
    """x:(N, n_head*d_v), w:(d_model, n_head*d_v) [PyTorch layout], residual:(N, d_model)."""
    N, d_in = x.shape
    d_model = w.shape[0]
    itemsize = jnp.dtype(ACT_DTYPE).itemsize
    row_bytes = 2 * itemsize * (d_in + 2 * d_model)                 # x + residual + out, dbl-buffered
    resident = 2 * 4 * (d_in * d_model + 3 * d_model)
    rt = _choose_row_tile(N, row_bytes, resident, _VMEM_BUDGET)
    grid = (pl.cdiv(N, rt),)
    cost = pl.CostEstimate(
        flops=int(2 * N * d_in * d_model + 10 * N * d_model),
        transcendentals=int(N),
        bytes_accessed=int(itemsize * N * (d_in + 2 * d_model) + 4 * (d_in * d_model + 3 * d_model)))
    return pl.pallas_call(
        _fc_res_ln_kernel,
        out_shape=jax.ShapeDtypeStruct((N, d_model), ACT_DTYPE),
        grid=grid,
        in_specs=[
            pl.BlockSpec((rt, d_in), lambda i: (i, 0)),            # fc input: row-tiled
            pl.BlockSpec((d_in, d_model), lambda i: (0, 0)),       # fc weight^T: VMEM-resident
            pl.BlockSpec((1, d_model), lambda i: (0, 0)),          # fc bias: resident
            pl.BlockSpec((rt, d_model), lambda i: (i, 0)),         # residual: row-tiled
            pl.BlockSpec((1, d_model), lambda i: (0, 0)),          # LN gamma: resident
            pl.BlockSpec((1, d_model), lambda i: (0, 0)),          # LN beta: resident
        ],
        out_specs=pl.BlockSpec((rt, d_model), lambda i: (i, 0)),
        compiler_params=_compiler_params(("parallel",)),
        cost_estimate=cost,
    )(x.astype(ACT_DTYPE), w.T.astype(ACT_DTYPE), b.reshape(1, -1).astype(jnp.float32),
      residual.astype(ACT_DTYPE), gamma.reshape(1, -1).astype(jnp.float32),
      beta.reshape(1, -1).astype(jnp.float32))


# -------------------------- Module wrapper (glue) ---------------------------

def init_mha_params(key, n_head, d_model, d_k, d_v):
    ks = jax.random.split(key, 8)
    std_qk = np.sqrt(2.0 / (d_model + d_k))
    std_v = np.sqrt(2.0 / (d_model + d_v))
    std_fc = np.sqrt(2.0 / (n_head * d_v + d_model))   # xavier_normal
    return {
        "w_qs_w": jax.random.normal(ks[0], (n_head * d_k, d_model), jnp.float32) * std_qk,
        "w_qs_b": jax.random.normal(ks[1], (n_head * d_k,), jnp.float32) * 0.01,
        "w_ks_w": jax.random.normal(ks[2], (n_head * d_k, d_model), jnp.float32) * std_qk,
        "w_ks_b": jax.random.normal(ks[3], (n_head * d_k,), jnp.float32) * 0.01,
        "w_vs_w": jax.random.normal(ks[4], (n_head * d_v, d_model), jnp.float32) * std_v,
        "w_vs_b": jax.random.normal(ks[5], (n_head * d_v,), jnp.float32) * 0.01,
        "fc_w": jax.random.normal(ks[6], (d_model, n_head * d_v), jnp.float32) * std_fc,
        "fc_b": jax.random.normal(ks[7], (d_model,), jnp.float32) * 0.01,
        "ln_gamma": jnp.ones((d_model,), jnp.float32),
        "ln_beta": jnp.zeros((d_model,), jnp.float32),
    }


def multi_head_attention(params, q, k, v, n_head, d_k, d_v):
    sz_b, len_q, d_model = q.shape
    _, len_k, _ = k.shape
    _, len_v, _ = v.shape

    residual = q.reshape(sz_b * len_q, d_model)
    xq = q.reshape(sz_b * len_q, d_model)
    xk = k.reshape(sz_b * len_k, d_model)
    xv = v.reshape(sz_b * len_v, d_model)

    if len_q == len_k == len_v:
        # Fused Q/K/V projection: one pipeline, activations read from HBM once each.
        qp, kp, vp = pallas_qkv_projection(
            xq, xk, xv,
            params["w_qs_w"], params["w_qs_b"],
            params["w_ks_w"], params["w_ks_b"],
            params["w_vs_w"], params["w_vs_b"])
    else:
        # TODO(synk): cross-attention with unequal lengths uses per-projection kernels.
        qp = pallas_linear(xq, params["w_qs_w"], params["w_qs_b"])
        kp = pallas_linear(xk, params["w_ks_w"], params["w_ks_b"])
        vp = pallas_linear(xv, params["w_vs_w"], params["w_vs_b"])

    # view(sz_b, len, n_head, d) -> permute(2,0,1,3) -> view(n_head*sz_b, len, d)
    # (kept in XLA: per-head 8-lane column slices are not legal BlockSpec blocks; tiny tensors)
    qh = qp.reshape(sz_b, len_q, n_head, d_k).transpose(2, 0, 1, 3).reshape(-1, len_q, d_k)
    kh = kp.reshape(sz_b, len_k, n_head, d_k).transpose(2, 0, 1, 3).reshape(-1, len_k, d_k)
    vh = vp.reshape(sz_b, len_v, n_head, d_v).transpose(2, 0, 1, 3).reshape(-1, len_v, d_v)

    temperature = float(np.power(d_k, 0.5))
    out, attn = pallas_sdp_attention(qh, kh, vh, temperature)

    # view(n_head, sz_b, len_q, d_v) -> permute(1,2,0,3) -> (sz_b*len_q, n_head*d_v)
    out = (out.reshape(n_head, sz_b, len_q, d_v)
              .transpose(1, 2, 0, 3)
              .reshape(sz_b * len_q, n_head * d_v))

    # fc + (dropout = identity) + residual + layer_norm fused in one row-tiled kernel
    final = pallas_fc_residual_layernorm(
        out, params["fc_w"], params["fc_b"], residual,
        params["ln_gamma"], params["ln_beta"]).reshape(sz_b, len_q, d_model)

    return final, attn


# ------------------------- pure-JAX reference (check) ------------------------

def _reference_mha(params, q, k, v, n_head, d_k, d_v):
    sz_b, len_q, d_model = q.shape
    _, len_k, _ = k.shape
    _, len_v, _ = v.shape
    residual = q

    def lin(x, w, b):
        return jnp.einsum("bld,od->blo", x, w) + b

    qh = lin(q, params["w_qs_w"], params["w_qs_b"]).reshape(sz_b, len_q, n_head, d_k)
    kh = lin(k, params["w_ks_w"], params["w_ks_b"]).reshape(sz_b, len_k, n_head, d_k)
    vh = lin(v, params["w_vs_w"], params["w_vs_b"]).reshape(sz_b, len_v, n_head, d_v)
    qh = qh.transpose(2, 0, 1, 3).reshape(-1, len_q, d_k)
    kh = kh.transpose(2, 0, 1, 3).reshape(-1, len_k, d_k)
    vh = vh.transpose(2, 0, 1, 3).reshape(-1, len_v, d_v)

    attn = jnp.einsum("bqd,bkd->bqk", qh, kh) / np.power(d_k, 0.5)
    attn = jax.nn.softmax(attn, axis=-1)
    out = jnp.einsum("bqk,bkd->bqd", attn, vh)
    out = (out.reshape(n_head, sz_b, len_q, d_v)
              .transpose(1, 2, 0, 3)
              .reshape(sz_b, len_q, n_head * d_v))
    out = jnp.einsum("blo,do->bld", out, params["fc_w"]) + params["fc_b"]
    z = out + residual
    mean = jnp.mean(z, axis=-1, keepdims=True)
    var = jnp.mean((z - mean) ** 2, axis=-1, keepdims=True)
    zn = (z - mean) / jnp.sqrt(var + 1e-5)
    return zn * params["ln_gamma"] + params["ln_beta"], attn


# ----------------------------------- main -----------------------------------

if __name__ == "__main__":
    n_head, d_model, d_k, d_v = 4, 32, 8, 8
    sz_b, seq = 2, 8

    key = jax.random.PRNGKey(0)
    kp_, kq_, kk_, kv_ = jax.random.split(key, 4)

    params = init_mha_params(kp_, n_head, d_model, d_k, d_v)
    q = jax.random.normal(kq_, (sz_b, seq, d_model), jnp.float32)
    k = jax.random.normal(kk_, (sz_b, seq, d_model), jnp.float32)
    v = jax.random.normal(kv_, (sz_b, seq, d_model), jnp.float32)

    mha = jax.jit(functools.partial(multi_head_attention, n_head=n_head, d_k=d_k, d_v=d_v))
    out, attn = mha(params, q, k, v)
    jax.block_until_ready((out, attn))

    assert out.shape == (sz_b, seq, d_model)
    assert attn.shape == (n_head * sz_b, seq, seq)
    assert bool(jnp.all(jnp.isfinite(out))) and bool(jnp.all(jnp.isfinite(attn)))

    ref_out, ref_attn = _reference_mha(params, q, k, v, n_head, d_k, d_v)
    assert bool(jnp.allclose(out.astype(jnp.float32), ref_out, atol=2e-2, rtol=2e-2))
    assert bool(jnp.allclose(attn.astype(jnp.float32), ref_attn, atol=2e-2, rtol=2e-2))

    print("KERNEL_OK")
</pallas_src>

<mosaic_0001>
module attributes {stable_mosaic.version = 11 : i64} {
  func.func @_qkv_proj_kernel(%arg0: i32, %arg1: memref<8x32xf32, #tpu.memory_space<vmem>>, %arg2: memref<8x32xf32, #tpu.memory_space<vmem>>, %arg3: memref<8x32xf32, #tpu.memory_space<vmem>>, %arg4: memref<32x32xf32, #tpu.memory_space<vmem>>, %arg5: memref<32x32xf32, #tpu.memory_space<vmem>>, %arg6: memref<32x32xf32, #tpu.memory_space<vmem>>, %arg7: memref<1x32xf32, #tpu.memory_space<vmem>>, %arg8: memref<1x32xf32, #tpu.memory_space<vmem>>, %arg9: memref<1x32xf32, #tpu.memory_space<vmem>>, %arg10: memref<8x32xf32, #tpu.memory_space<vmem>>, %arg11: memref<8x32xf32, #tpu.memory_space<vmem>>, %arg12: memref<8x32xf32, #tpu.memory_space<vmem>>) attributes {dimension_semantics = [#tpu.dimension_semantics<parallel>], iteration_bounds = array<i64: 2>, scalar_prefetch = 0 : i64, scratch_operands = 0 : i64, tpu.core_type = #tpu.core_type<tc>, window_params = [{transform_indices = @transform_0, window_bounds = array<i64: 8, 32>}, {transform_indices = @transform_1, window_bounds = array<i64: 8, 32>}, {transform_indices = @transform_2, window_bounds = array<i64: 8, 32>}, {pipeline_mode = #tpu.pipeline_mode<synchronous>, transform_indices = @transform_3, window_bounds = array<i64: 32, 32>}, {pipeline_mode = #tpu.pipeline_mode<synchronous>, transform_indices = @transform_4, window_bounds = array<i64: 32, 32>}, {pipeline_mode = #tpu.pipeline_mode<synchronous>, transform_indices = @transform_5, window_bounds = array<i64: 32, 32>}, {pipeline_mode = #tpu.pipeline_mode<synchronous>, transform_indices = @transform_6, window_bounds = array<i64: 1, 32>}, {pipeline_mode = #tpu.pipeline_mode<synchronous>, transform_indices = @transform_7, window_bounds = array<i64: 1, 32>}, {pipeline_mode = #tpu.pipeline_mode<synchronous>, transform_indices = @transform_8, window_bounds = array<i64: 1, 32>}, {transform_indices = @transform_9, window_bounds = array<i64: 8, 32>}, {transform_indices = @transform_10, window_bounds = array<i64: 8, 32>}, {transform_indices = @transform_11, window_bounds = array<i64: 8, 32>}]} {
    %c0 = arith.constant 0 : index
    %c0_0 = arith.constant 0 : index
    %0 = vector.load %arg1[%c0, %c0_0] : memref<8x32xf32, #tpu.memory_space<vmem>>, vector<8x32xf32>
    %c0_1 = arith.constant 0 : index
    %c0_2 = arith.constant 0 : index
    %1 = vector.load %arg4[%c0_1, %c0_2] : memref<32x32xf32, #tpu.memory_space<vmem>>, vector<32x32xf32>
    %cst = arith.constant dense<0.000000e+00> : vector<8x32xf32>
    %2 = tpu.matmul %0, %1, %cst {dimension_numbers = #tpu.dot_dimension_numbers<[1], [0], [0], [1], [0, 0, 1, 1], [], []>} : vector<8x32xf32>, vector<32x32xf32>, vector<8x32xf32> -> vector<8x32xf32>
    %c0_3 = arith.constant 0 : index
    %c0_4 = arith.constant 0 : index
    %3 = vector.load %arg7[%c0_3, %c0_4] : memref<1x32xf32, #tpu.memory_space<vmem>>, vector<1x32xf32>
    %4 = vector.broadcast %3 : vector<1x32xf32> to vector<8x32xf32>
    %5 = arith.addf %2, %4 : vector<8x32xf32>
    %c0_5 = arith.constant 0 : index
    %c0_6 = arith.constant 0 : index
    %6 = vector.load %arg10[%c0_5, %c0_6] : memref<8x32xf32, #tpu.memory_space<vmem>>, vector<8x32xf32>
    tpu.vector_store %arg10[%c0_5, %c0_6], %5 {strides = array<i32>} : memref<8x32xf32, #tpu.memory_space<vmem>>, vector<8x32xf32>,
    %c0_7 = arith.constant 0 : index
    %c0_8 = arith.constant 0 : index
    %7 = vector.load %arg2[%c0_7, %c0_8] : memref<8x32xf32, #tpu.memory_space<vmem>>, vector<8x32xf32>
    %c0_9 = arith.constant 0 : index
    %c0_10 = arith.constant 0 : index
    %8 = vector.load %arg5[%c0_9, %c0_10] : memref<32x32xf32, #tpu.memory_space<vmem>>, vector<32x32xf32>
    %cst_11 = arith.constant dense<0.000000e+00> : vector<8x32xf32>
    %9 = tpu.matmul %7, %8, %cst_11 {dimension_numbers = #tpu.dot_dimension_numbers<[1], [0], [0], [1], [0, 0, 1, 1], [], []>} : vector<8x32xf32>, vector<32x32xf32>, vector<8x32xf32> -> vector<8x32xf32>
    %c0_12 = arith.constant 0 : index
    %c0_13 = arith.constant 0 : index
    %10 = vector.load %arg8[%c0_12, %c0_13] : memref<1x32xf32, #tpu.memory_space<vmem>>, vector<1x32xf32>
    %11 = vector.broadcast %10 : vector<1x32xf32> to vector<8x32xf32>
    %12 = arith.addf %9, %11 : vector<8x32xf32>
    %c0_14 = arith.constant 0 : index
    %c0_15 = arith.constant 0 : index
    %13 = vector.load %arg11[%c0_14, %c0_15] : memref<8x32xf32, #tpu.memory_space<vmem>>, vector<8x32xf32>
    tpu.vector_store %arg11[%c0_14, %c0_15], %12 {strides = array<i32>} : memref<8x32xf32, #tpu.memory_space<vmem>>, vector<8x32xf32>,
    %c0_16 = arith.constant 0 : index
    %c0_17 = arith.constant 0 : index
    %14 = vector.load %arg3[%c0_16, %c0_17] : memref<8x32xf32, #tpu.memory_space<vmem>>, vector<8x32xf32>
    %c0_18 = arith.constant 0 : index
    %c0_19 = arith.constant 0 : index
    %15 = vector.load %arg6[%c0_18, %c0_19] : memref<32x32xf32, #tpu.memory_space<vmem>>, vector<32x32xf32>
    %cst_20 = arith.constant dense<0.000000e+00> : vector<8x32xf32>
    %16 = tpu.matmul %14, %15, %cst_20 {dimension_numbers = #tpu.dot_dimension_numbers<[1], [0], [0], [1], [0, 0, 1, 1], [], []>} : vector<8x32xf32>, vector<32x32xf32>, vector<8x32xf32> -> vector<8x32xf32>
    %c0_21 = arith.constant 0 : index
    %c0_22 = arith.constant 0 : index
    %17 = vector.load %arg9[%c0_21, %c0_22] : memref<1x32xf32, #tpu.memory_space<vmem>>, vector<1x32xf32>
    %18 = vector.broadcast %17 : vector<1x32xf32> to vector<8x32xf32>
    %19 = arith.addf %16, %18 : vector<8x32xf32>
    %c0_23 = arith.constant 0 : index
    %c0_24 = arith.constant 0 : index
    %20 = vector.load %arg12[%c0_23, %c0_24] : memref<8x32xf32, #tpu.memory_space<vmem>>, vector<8x32xf32>
    tpu.vector_store %arg12[%c0_23, %c0_24], %19 {strides = array<i32>} : memref<8x32xf32, #tpu.memory_space<vmem>>, vector<8x32xf32>,
    return
  }
  func.func @transform_0(%arg0: i32) -> (i32, i32) {
    %c0_i32 = arith.constant 0 : i32
    %c0_i32_0 = arith.constant 0 : i32
    return %arg0, %c0_i32 : i32, i32
  }
  func.func @transform_1(%arg0: i32) -> (i32, i32) {
    %c0_i32 = arith.constant 0 : i32
    %c0_i32_0 = arith.constant 0 : i32
    return %arg0, %c0_i32 : i32, i32
  }
  func.func @transform_2(%arg0: i32) -> (i32, i32) {
    %c0_i32 = arith.constant 0 : i32
    %c0_i32_0 = arith.constant 0 : i32
    return %arg0, %c0_i32 : i32, i32
  }
  func.func @transform_3(%arg0: i32) -> (i32, i32) {
    %c0_i32 = arith.constant 0 : i32
    %c0_i32_0 = arith.constant 0 : i32
    %c0_i32_1 = arith.constant 0 : i32
    return %c0_i32, %c0_i32_0 : i32, i32
  }
  func.func @transform_4(%arg0: i32) -> (i32, i32) {
    %c0_i32 = arith.constant 0 : i32
    %c0_i32_0 = arith.constant 0 : i32
    %c0_i32_1 = arith.constant 0 : i32
    return %c0_i32, %c0_i32_0 : i32, i32
  }
  func.func @transform_5(%arg0: i32) -> (i32, i32) {
    %c0_i32 = arith.constant 0 : i32
    %c0_i32_0 = arith.constant 0 : i32
    %c0_i32_1 = arith.constant 0 : i32
    return %c0_i32, %c0_i32_0 : i32, i32
  }
  func.func @transform_6(%arg0: i32) -> (i32, i32) {
    %c0_i32 = arith.constant 0 : i32
    %c0_i32_0 = arith.constant 0 : i32
    %c0_i32_1 = arith.constant 0 : i32
    return %c0_i32, %c0_i32_0 : i32, i32
  }
  func.func @transform_7(%arg0: i32) -> (i32, i32) {
    %c0_i32 = arith.constant 0 : i32
    %c0_i32_0 = arith.constant 0 : i32
    %c0_i32_1 = arith.constant 0 : i32
    return %c0_i32, %c0_i32_0 : i32, i32
  }
  func.func @transform_8(%arg0: i32) -> (i32, i32) {
    %c0_i32 = arith.constant 0 : i32
    %c0_i32_0 = arith.constant 0 : i32
    %c0_i32_1 = arith.constant 0 : i32
    return %c0_i32, %c0_i32_0 : i32, i32
  }
  func.func @transform_9(%arg0: i32) -> (i32, i32) {
    %c0_i32 = arith.constant 0 : i32
    %c0_i32_0 = arith.constant 0 : i32
    return %arg0, %c0_i32 : i32, i32
  }
  func.func @transform_10(%arg0: i32) -> (i32, i32) {
    %c0_i32 = arith.constant 0 : i32
    %c0_i32_0 = arith.constant 0 : i32
    return %arg0, %c0_i32 : i32, i32
  }
  func.func @transform_11(%arg0: i32) -> (i32, i32) {
    %c0_i32 = arith.constant 0 : i32
    %c0_i32_0 = arith.constant 0 : i32
    return %arg0, %c0_i32 : i32, i32
  }
}

module attributes {stable_mosaic.version = 11 : i64} {
  func.func @_fc_res_ln_kernel(%arg0: i32, %arg1: memref<8x32xf32, #tpu.memory_space<vmem>>, %arg2: memref<32x32xf32, #tpu.memory_space<vmem>>, %arg3: memref<1x32xf32, #tpu.memory_space<vmem>>, %arg4: memref<8x32xf32, #tpu.memory_space<vmem>>, %arg5: memref<1x32xf32, #tpu.memory_space<vmem>>, %arg6: memref<1x32xf32, #tpu.memory_space<vmem>>, %arg7: memref<8x32xf32, #tpu.memory_space<vmem>>) attributes {dimension_semantics = [#tpu.dimension_semantics<parallel>], iteration_bounds = array<i64: 2>, scalar_prefetch = 0 : i64, scratch_operands = 0 : i64, tpu.core_type = #tpu.core_type<tc>, window_params = [{transform_indices = @transform_0, window_bounds = array<i64: 8, 32>}, {pipeline_mode = #tpu.pipeline_mode<synchronous>, transform_indices = @transform_1, window_bounds = array<i64: 32, 32>}, {pipeline_mode = #tpu.pipeline_mode<synchronous>, transform_indices = @transform_2, window_bounds = array<i64: 1, 32>}, {transform_indices = @transform_3, window_bounds = array<i64: 8, 32>}, {pipeline_mode = #tpu.pipeline_mode<synchronous>, transform_indices = @transform_4, window_bounds = array<i64: 1, 32>}, {pipeline_mode = #tpu.pipeline_mode<synchronous>, transform_indices = @transform_5, window_bounds = array<i64: 1, 32>}, {transform_indices = @transform_6, window_bounds = array<i64: 8, 32>}]} {
    %c0 = arith.constant 0 : index
    %c0_0 = arith.constant 0 : index
    %0 = vector.load %arg1[%c0, %c0_0] : memref<8x32xf32, #tpu.memory_space<vmem>>, vector<8x32xf32>
    %c0_1 = arith.constant 0 : index
    %c0_2 = arith.constant 0 : index
    %1 = vector.load %arg2[%c0_1, %c0_2] : memref<32x32xf32, #tpu.memory_space<vmem>>, vector<32x32xf32>
    %cst = arith.constant dense<0.000000e+00> : vector<8x32xf32>
    %2 = tpu.matmul %0, %1, %cst {dimension_numbers = #tpu.dot_dimension_numbers<[1], [0], [0], [1], [0, 0, 1, 1], [], []>} : vector<8x32xf32>, vector<32x32xf32>, vector<8x32xf32> -> vector<8x32xf32>
    %c0_3 = arith.constant 0 : index
    %c0_4 = arith.constant 0 : index
    %3 = vector.load %arg3[%c0_3, %c0_4] : memref<1x32xf32, #tpu.memory_space<vmem>>, vector<1x32xf32>
    %4 = vector.broadcast %3 : vector<1x32xf32> to vector<8x32xf32>
    %5 = arith.addf %2, %4 : vector<8x32xf32>
    %c0_5 = arith.constant 0 : index
    %c0_6 = arith.constant 0 : index
    %6 = vector.load %arg4[%c0_5, %c0_6] : memref<8x32xf32, #tpu.memory_space<vmem>>, vector<8x32xf32>
    %7 = arith.addf %5, %6 : vector<8x32xf32>
    %cst_7 = arith.constant dense<0.000000e+00> : vector<8xf32>
    %8 = vector.multi_reduction <add>, %7, %cst_7 [1] : vector<8x32xf32> to vector<8xf32>
    %9 = vector.shape_cast %8 : vector<8xf32> to vector<8x1xf32>
    %cst_8 = arith.constant 3.200000e+01 : f32
    %10 = vector.broadcast %cst_8 : f32 to vector<8x1xf32>
    %11 = arith.divf %9, %10 : vector<8x1xf32>
    %12 = vector.broadcast %11 : vector<8x1xf32> to vector<8x32xf32>
    %13 = arith.subf %7, %12 : vector<8x32xf32>
    %14 = arith.mulf %13, %13 : vector<8x32xf32>
    %cst_9 = arith.constant dense<0.000000e+00> : vector<8xf32>
    %15 = vector.multi_reduction <add>, %14, %cst_9 [1] : vector<8x32xf32> to vector<8xf32>
    %16 = vector.shape_cast %15 : vector<8xf32> to vector<8x1xf32>
    %cst_10 = arith.constant 3.200000e+01 : f32
    %17 = vector.broadcast %cst_10 : f32 to vector<8x1xf32>
    %18 = arith.divf %16, %17 : vector<8x1xf32>
    %19 = vector.broadcast %11 : vector<8x1xf32> to vector<8x32xf32>
    %20 = arith.subf %7, %19 : vector<8x32xf32>
    %cst_11 = arith.constant 9.99999974E-6 : f32
    %21 = vector.broadcast %cst_11 : f32 to vector<8x1xf32>
    %22 = arith.addf %18, %21 : vector<8x1xf32>
    %23 = math.rsqrt %22 : vector<8x1xf32>
    %24 = vector.broadcast %23 : vector<8x1xf32> to vector<8x32xf32>
    %25 = arith.mulf %20, %24 : vector<8x32xf32>
    %c0_12 = arith.constant 0 : index
    %c0_13 = arith.constant 0 : index
    %26 = vector.load %arg5[%c0_12, %c0_13] : memref<1x32xf32, #tpu.memory_space<vmem>>, vector<1x32xf32>
    %27 = vector.broadcast %26 : vector<1x32xf32> to vector<8x32xf32>
    %28 = arith.mulf %25, %27 : vector<8x32xf32>
    %c0_14 = arith.constant 0 : index
    %c0_15 = arith.constant 0 : index
    %29 = vector.load %arg6[%c0_14, %c0_15] : memref<1x32xf32, #tpu.memory_space<vmem>>, vector<1x32xf32>
    %30 = vector.broadcast %29 : vector<1x32xf32> to vector<8x32xf32>
    %31 = arith.addf %28, %30 : vector<8x32xf32>
    %c0_16 = arith.constant 0 : index
    %c0_17 = arith.constant 0 : index
    %32 = vector.load %arg7[%c0_16, %c0_17] : memref<8x32xf32, #tpu.memory_space<vmem>>, vector<8x32xf32>
    tpu.vector_store %arg7[%c0_16, %c0_17], %31 {strides = array<i32>} : memref<8x32xf32, #tpu.memory_space<vmem>>, vector<8x32xf32>,
    return
  }
  func.func @transform_0(%arg0: i32) -> (i32, i32) {
    %c0_i32 = arith.constant 0 : i32
    %c0_i32_0 = arith.constant 0 : i32
    return %arg0, %c0_i32 : i32, i32
  }
  func.func @transform_1(%arg0: i32) -> (i32, i32) {
    %c0_i32 = arith.constant 0 : i32
    %c0_i32_0 = arith.constant 0 : i32
    %c0_i32_1 = arith.constant 0 : i32
    return %c0_i32, %c0_i32_0 : i32, i32
  }
  func.func @transform_2(%arg0: i32) -> (i32, i32) {
    %c0_i32 = arith.constant 0 : i32
    %c0_i32_0 = arith.constant 0 : i32
    %c0_i32_1 = arith.constant 0 : i32
    return %c0_i32, %c0_i32_0 : i32, i32
  }
  func.func @transform_3(%arg0: i32) -> (i32, i32) {
    %c0_i32 = arith.constant 0 : i32
    %c0_i32_0 = arith.constant 0 : i32
    return %arg0, %c0_i32 : i32, i32
  }
  func.func @transform_4(%arg0: i32) -> (i32, i32) {
    %c0_i32 = arith.constant 0 : i32
    %c0_i32_0 = arith.constant 0 : i32
    %c0_i32_1 = arith.constant 0 : i32
    return %c0_i32, %c0_i32_0 : i32, i32
  }
  func.func @transform_5(%arg0: i32) -> (i32, i32) {
    %c0_i32 = arith.constant 0 : i32
    %c0_i32_0 = arith.constant 0 : i32
    %c0_i32_1 = arith.constant 0 : i32
    return %c0_i32, %c0_i32_0 : i32, i32
  }
  func.func @transform_6(%arg0: i32) -> (i32, i32) {
    %c0_i32 = arith.constant 0 : i32
    %c0_i32_0 = arith.constant 0 : i32
    return %arg0, %c0_i32 : i32, i32
  }
}

module attributes {stable_mosaic.version = 11 : i64} {
  func.func @_attn_kernel(%arg0: i32, %arg1: i32, %arg2: memref<4x8x8xf32, #tpu.memory_space<vmem>>, %arg3: memref<4x8x8xf32, #tpu.memory_space<vmem>>, %arg4: memref<4x8x8xf32, #tpu.memory_space<vmem>>, %arg5: memref<4x8x8xf32, #tpu.memory_space<vmem>>, %arg6: memref<4x8x8xf32, #tpu.memory_space<vmem>>) attributes {dimension_semantics = [#tpu.dimension_semantics<parallel>, #tpu.dimension_semantics<parallel>], iteration_bounds = array<i64: 2, 1>, scalar_prefetch = 0 : i64, scratch_operands = 0 : i64, tpu.core_type = #tpu.core_type<tc>, window_params = [{transform_indices = @transform_0, window_bounds = array<i64: 4, 8, 8>}, {transform_indices = @transform_1, window_bounds = array<i64: 4, 8, 8>}, {transform_indices = @transform_2, window_bounds = array<i64: 4, 8, 8>}, {transform_indices = @transform_3, window_bounds = array<i64: 4, 8, 8>}, {transform_indices = @transform_4, window_bounds = array<i64: 4, 8, 8>}]} {
    %c0 = arith.constant 0 : index
    %c0_0 = arith.constant 0 : index
    %c0_1 = arith.constant 0 : index
    %0 = vector.load %arg2[%c0, %c0_0, %c0_1] : memref<4x8x8xf32, #tpu.memory_space<vmem>>, vector<4x8x8xf32>
    %cst = arith.constant 0.353553385 : f32
    %1 = vector.broadcast %cst : f32 to vector<4x8x8xf32>
    %2 = arith.mulf %0, %1 : vector<4x8x8xf32>
    %c0_2 = arith.constant 0 : index
    %c0_3 = arith.constant 0 : index
    %c0_4 = arith.constant 0 : index
    %3 = vector.load %arg3[%c0_2, %c0_3, %c0_4] : memref<4x8x8xf32, #tpu.memory_space<vmem>>, vector<4x8x8xf32>
    "tpu.trace_start"() <{level = 10 : i32, message = "bqd,bkd->bqk"}> : () -> ()
    %cst_5 = arith.constant dense<0.000000e+00> : vector<4x8x8xf32>
    %4 = tpu.matmul %2, %3, %cst_5 {dimension_numbers = #tpu.dot_dimension_numbers<[2], [2], [1], [1], [0, 0, 0, 1, 1, 1], [0], [0]>} : vector<4x8x8xf32>, vector<4x8x8xf32>, vector<4x8x8xf32> -> vector<4x8x8xf32>
    "tpu.trace_stop"() : () -> ()
    %cst_6 = arith.constant dense<0xFF800000> : vector<4x8xf32>
    %5 = vector.multi_reduction <maximumf>, %4, %cst_6 [2] : vector<4x8x8xf32> to vector<4x8xf32>
    %6 = vector.shape_cast %5 : vector<4x8xf32> to vector<4x8x1xf32>
    %7 = vector.broadcast %6 : vector<4x8x1xf32> to vector<4x8x8xf32>
    %8 = arith.subf %4, %7 : vector<4x8x8xf32>
    %9 = math.exp %8 : vector<4x8x8xf32>
    %cst_7 = arith.constant dense<0.000000e+00> : vector<4x8xf32>
    %10 = vector.multi_reduction <add>, %9, %cst_7 [2] : vector<4x8x8xf32> to vector<4x8xf32>
    %11 = vector.shape_cast %10 : vector<4x8xf32> to vector<4x8x1xf32>
    %12 = tpu.reciprocal %11 {approx = true} : vector<4x8x1xf32> -> vector<4x8x1xf32>
    %13 = vector.broadcast %12 : vector<4x8x1xf32> to vector<4x8x8xf32>
    %14 = arith.mulf %9, %13 : vector<4x8x8xf32>
    %c0_8 = arith.constant 0 : index
    %c0_9 = arith.constant 0 : index
    %c0_10 = arith.constant 0 : index
    %15 = vector.load %arg6[%c0_8, %c0_9, %c0_10] : memref<4x8x8xf32, #tpu.memory_space<vmem>>, vector<4x8x8xf32>
    tpu.vector_store %arg6[%c0_8, %c0_9, %c0_10], %14 {strides = array<i32>} : memref<4x8x8xf32, #tpu.memory_space<vmem>>, vector<4x8x8xf32>,
    %c0_11 = arith.constant 0 : index
    %c0_12 = arith.constant 0 : index
    %c0_13 = arith.constant 0 : index
    %16 = vector.load %arg4[%c0_11, %c0_12, %c0_13] : memref<4x8x8xf32, #tpu.memory_space<vmem>>, vector<4x8x8xf32>
    "tpu.trace_start"() <{level = 10 : i32, message = "bqk,bkd->bqd"}> : () -> ()
    %cst_14 = arith.constant dense<0.000000e+00> : vector<4x8x8xf32>
    %17 = tpu.matmul %14, %16, %cst_14 {dimension_numbers = #tpu.dot_dimension_numbers<[2], [1], [1], [2], [0, 0, 0, 1, 1, 2], [0], [0]>} : vector<4x8x8xf32>, vector<4x8x8xf32>, vector<4x8x8xf32> -> vector<4x8x8xf32>
    "tpu.trace_stop"() : () -> ()
    %c0_15 = arith.constant 0 : index
    %c0_16 = arith.constant 0 : index
    %c0_17 = arith.constant 0 : index
    %18 = vector.load %arg5[%c0_15, %c0_16, %c0_17] : memref<4x8x8xf32, #tpu.memory_space<vmem>>, vector<4x8x8xf32>
    tpu.vector_store %arg5[%c0_15, %c0_16, %c0_17], %17 {strides = array<i32>} : memref<4x8x8xf32, #tpu.memory_space<vmem>>, vector<4x8x8xf32>,
    return
  }
  func.func @transform_0(%arg0: i32, %arg1: i32) -> (i32, i32, i32) {
    %c0_i32 = arith.constant 0 : i32
    %c0_i32_0 = arith.constant 0 : i32
    return %arg0, %arg1, %c0_i32 : i32, i32, i32
  }
  func.func @transform_1(%arg0: i32, %arg1: i32) -> (i32, i32, i32) {
    %c0_i32 = arith.constant 0 : i32
    %c0_i32_0 = arith.constant 0 : i32
    %c0_i32_1 = arith.constant 0 : i32
    return %arg0, %c0_i32, %c0_i32_0 : i32, i32, i32
  }
  func.func @transform_2(%arg0: i32, %arg1: i32) -> (i32, i32, i32) {
    %c0_i32 = arith.constant 0 : i32
    %c0_i32_0 = arith.constant 0 : i32
    %c0_i32_1 = arith.constant 0 : i32
    return %arg0, %c0_i32, %c0_i32_0 : i32, i32, i32
  }
  func.func @transform_3(%arg0: i32, %arg1: i32) -> (i32, i32, i32) {
    %c0_i32 = arith.constant 0 : i32
    %c0_i32_0 = arith.constant 0 : i32
    return %arg0, %arg1, %c0_i32 : i32, i32, i32
  }
  func.func @transform_4(%arg0: i32, %arg1: i32) -> (i32, i32, i32) {
    %c0_i32 = arith.constant 0 : i32
    %c0_i32_0 = arith.constant 0 : i32
    return %arg0, %arg1, %c0_i32 : i32, i32, i32
  }
}

</mosaic_0001>

<bundles_post_ra>
// kernel: multi_head_attention.5
= control target key start
LH: loop header
LB: loop body
LE: loop exit
PB: predicated region body
PF: predicated region fallthrough
CT: control target
= control target key end

     0   :  { %11 = vsyncpa [#allocation3], 0  ;;  %s780_s0 = inlined_call_operand.vmem [shape: f32[16,32], index: 0, kind: input, shape index: {}]   ;;  %s781_s1 = inlined_call_operand.vmem [shape: f32[32,32], index: 1, kind: input, shape index: {}]   ;;  %s782_s2 = inlined_call_operand.vmem [shape: f32[1,32], index: 2, kind: input, shape index: {}]   ;;  %s783_s3 = inlined_call_operand.vmem [shape: f32[16,32], index: 3, kind: input, shape index: {}]   ;;  %s784_s4 = inlined_call_operand.vmem [shape: f32[1,32], index: 4, kind: input, shape index: {}]   ;;  %s785_s5 = inlined_call_operand.vmem [shape: f32[1,32], index: 5, kind: input, shape index: {}]   ;;  %s786_s6 = inlined_call_operand.hbm [shape: f32[16,32], index: 6, kind: output, shape index: {}]  }
   0x1   :  { %13 = vsyncpa [#allocation3 + $0x1], 0  ;;  %s652_s21 = smov 0   ;;  %s654_s22 = smov 0  }
   0x2   :  { %s656_s23 = smov 0   ;;  %s658_s24 = smov 0  }
   0x3 LB: > { %s673_s25 = sadd.s32 4294967295, %s611_s24   ;;  %s468_s26 = sadd.s32 4294967294, %s611_s24   ;;  %s611_s24 = sphi %s658_s24, %s792_s24   ;;  %s607_s23 = sphi %s656_s23, %s791_s23   ;;  %s603_s22 = sphi %s654_s22, %s790_s22   ;;  %s599_s21 = sphi %s652_s21, %s789_s21  }
   0x4   : > { %s677_s27 = sadd.s32 1, %s611_s24   ;;  %s162_s28 = sadd.s32 1, %s607_s23 }
   0x5   : > { %s159_s29 = ssub.s32 %s611_s24, %s677_s27  ;;  %p172_p0 = scmp.ne.s32.totalorder %s607_s23, %s603_s22 }
   0x6   : > { %p160_p1 = scmp.eq.s32.totalorder %s159_s29, 0  ;;  %p173_p2 = scmp.eq.s32.totalorder %s673_s25, 1 }
   0x7   : > { %p178_p3 = scmp.ne.s32.totalorder %s603_s22, %s599_s21  ;;  %p179_p4 = scmp.eq.s32.totalorder %s468_s26, 1 }
   0x8   : > { %s688_s30 = scalar_select %p160_p1, %s607_s23, %s162_s28  }
   0x9   : > { %p690_p5 = por %p173_p2, %p172_p0  ;;  %p694_p6 = por %p179_p4, %p178_p3 }
   0xa   : > { %p471_p7 = scmp.ge.s32.totalorder %s611_s24, 1  ;;  %p223_p8 = scmp.lt.s32.totalorder %s611_s24, 3 }
   0xc   : > { %p224_p9 = pnand %p471_p7, %p223_p8 }
   0xd   : > { %v265_v0 = vld [vmem:[%s781_s1] sm:$0xff] (!%p224_p9)  ;;  %v266_v1 = vld [vmem:[%s781_s1 + $0x8] sm:$0xff] (!%p224_p9)  ;;  %v267_v2 = vld [vmem:[%s781_s1 + $0x10] sm:$0xff] (!%p224_p9)  ;;  %v613_v3 = vmov (!%p224_p9), 0.0|0.0   ;;  %vm614_vm0 = vmmov (!%p224_p9), 0   ;;  %v615_v6 = vmov (!%p224_p9), 0.0  }
   0xe   : > { %227 = sbr.rel (%p224_p9) target bundleno = 569 (0x239), region = 44  ;;  %499 = vmatprep.subr.bf16.mxu0 (!%p224_p9), %v613_v3  ;;  %v500_v4 = vpack.c.bf16 (!%p224_p9), %v266_v1, %v265_v0  ;;  %v268_v5 = vld [vmem:[%s781_s1 + $0x18] sm:$0xff] (!%p224_p9)  ;;  %496 = vmatprep.mubr.msk.f32.mxu0 (!%p224_p9), %vm614_vm0, %v615_v6  ;;  %p256_p10 = scmp.lt.s32.totalorder (!%p224_p9), %s673_s25, 1  ;;  %vm276_vm1 = vcmask (!%p224_p9), 261120   ;;  %v475_v9 = vld [vmem:[%s782_s2] ss:$0 sm:$0xff] (!%p224_p9) }
   0xf   : > { %v503_v7 = vpack.c.bf16 (!%p224_p9), %v268_v5, %v267_v2  ;;  %s253_s12 = sand.u32 (!%p224_p9), 1, %s603_s22   ;;  %v477_v25 = vld [vmem:[%s784_s4] ss:$0 sm:$0xff] (!%p224_p9) }
  0x10   : > { %501 = vmatpush3.bf16.msra.mxu0 (!%p224_p9), %v500_v4  ;;  %s472_s13 = sshll.u32 (!%p224_p9), %s253_s12, 3  ;;  %v478_v27 = vld [vmem:[%s785_s5] ss:$0 sm:$0xff] (!%p224_p9) }
  0x11   : > { %502 = vmatprep.subr.bf16.mxu0 (!%p224_p9), %v613_v3  ;;  %s255_s19 = scalar_lea.vmem (!%p224_p9), [#allocation2], %s472_s13 }
  0x12   : > { %s397_s20 = sshll.u32 (!%p224_p9), %s255_s19, 4  ;;  %s739_s20 = int_to_ptr.vmem [resolvable:$true] %s397_s20 }
  0x13   : > { %s549_s10 = scalar_lea.vmem (!%p224_p9), %s739_s20, 128 }
  0x14   : > { %504 = vmatpush3.bf16.msra.mxu0 (!%p224_p9), %v503_v7  ;;  %p550_p11 = scmp.ne.s32.totalorder (!%p224_p9), %s739_s20, %s549_s10 }
  0x15   : > { %s257_s17 = scalar_select %p256_p10, %s673_s25, 1 }
  0x16   : > { %p551_p12 = pnand %p550_p11, %p690_p5 }
  0x17   : > { %s473_s18 = sshll.u32 %s257_s17, 3 }
  0x18   : > { %s259_s26 = scalar_lea.vmem %s780_s0, %s473_s18  ;;  %s263_s9 = scalar_lea.vmem %s783_s3, %s473_s18 }
  0x19   : > { %v264_v8 = vld [vmem:[%s259_s26] sm:$0xff]  ;;  %s480_s18 = sshll.u32 %s673_s25, 7  ;;  %p552_p13 = pneg %p551_p12 }
  0x1a   : > { %497 = vmatmul.mubr.msk.f32.vlgmr.msra.gmra.mrb[0].mxu0 %vm276_vm1, %v264_v8  ;;  %v350_v11 = vld [vmem:[%s263_s9] sm:$0xff]  ;;  %s737_s29 = scalar_lea.hbm %s786_s6, %s480_s18  ;;  %s384_s9 = scalar_lea.sflag [#allocation3], %s253_s12 }
  0x1b   : > { %s616_s25 = smov [#allocation2]  }
  0x1c   : > { %s553_s11 = sshll.u32 %s616_s25, 4  ;;  %s554_s11 = int_to_ptr.vmem [resolvable:$false] %s553_s11 }
  0x1d   : > { %s555_s13 = scalar_lea.vmem %s554_s11, 256  ;;  %p556_p0 = scmp.lt.s32.totalorder %s739_s20, %s554_s11 }
  0x1e   : > { %p557_p1 = scmp.lt.s32.totalorder %s555_s13, %s549_s10 }
  0x20   : > { %p558_p2 = por %p557_p1, %p556_p0 }
  0x22   : > { %p559_p3 = pnand %p558_p2, %p552_p13 }
  0xed   : > { %v346_v10 = vpop.f32.mrb[0].mxu0 }
  0xee   : > { %v347_v12 = vadd.f32 %v475_v9, %v346_v10  ;;  %v498_v13 = vpop.f32.mrb[1].mxu0 }
  0xf0   : > { %v351_v14 = vadd.f32 %v350_v11, %v347_v12 }
  0xf2   : > { %v352_v15 = vsel %vm276_vm1, %v351_v14, 0.0 }
  0xf3   : > { %353 = vadd.xlane.f32.xlu0 %v352_v15 }
 0x180   : > { %v354_v16 = vpop.xlane.xlu0 %353 }
 0x181   : > { %v356_v17 = vmul.f32 0.03125, %v354_v16 }
 0x183   : > { %v357_v18 = vsub.f32 %v351_v14, %v356_v17 }
 0x185   : > { %v358_v19 = vmul.f32 %v357_v18, %v357_v18 }
 0x187   : > { %v359_v20 = vsel %vm276_vm1, %v358_v19, 0.0 }
 0x188   : > { %360 = vadd.xlane.f32.xlu0 %v359_v20 }
 0x215   : > { %v361_v21 = vpop.xlane.xlu0 %360 }
 0x216   : > { %v362_v22 = vmul.f32 0.03125, %v361_v21 }
 0x218   : > { %v363_v23 = vadd.f32 1e-05, %v362_v22 }
 0x21a   : > { %547 = vrsqrt.f32 %v363_v23 }
 0x224   : > { %v548_v24 = vpop.eup %547 }
 0x225   : > { %v365_v26 = vmul.f32 %v548_v24, %v357_v18 }
 0x227   : > { %v373_v28 = vmul.f32 %v477_v25, %v365_v26 }
 0x229   : > { %v381_v29 = vadd.f32 %v478_v27, %v373_v28 }
 0x22b   : > { %382 = vst.msk [vmem:[%s255_s19] sm:$0xff] %vm276_vm1, %v381_v29 }
 0x22c   : > { %562 = shalt.err (!%p559_p3)
}
 0x22d   : > { %s563_s12 = scalar_lea.hbm %s737_s29, 128  ;;  %s567_s16 = scalar_lea.hbm %s786_s6, 256 }
 0x22e   : > { %p564_p4 = scmp.ne.s32.totalorder %s737_s29, %s563_s12  ;;  %p568_p9 = scmp.lt.u32.totalorder %s737_s29, %s786_s6 }
 0x22f   : > { %p569_p10 = scmp.lt.u32.totalorder %s567_s16, %s563_s12  ;;  %p571_p12 = scmp.lt.u32.totalorder %s563_s12, %s737_s29 }
 0x230   : > { %p565_p7 = pnand %p564_p4, %p690_p5 }
 0x231   : > { %p570_p11 = por %p569_p10, %p568_p9 }
 0x232   : > { %p566_p8 = pneg %p565_p7 }
 0x233   : > { %p572_p13 = por %p571_p12, %p570_p11 }
 0x235   : > { %p573_p0 = pnand %p572_p13, %p566_p8 }
 0x237   : > { %576 = shalt.err (!%p573_p0)
}
 0x238   : > { %505 = dma.vmem_to_hbm [thread:$0]  (%p690_p5), %s739_s20, 128, %s737_s29, %s384_s9  }
 0x239 PF: > { %p511_p1 = scmp.ge.s32.totalorder %s611_s24, 2  ;;  %s409_s19 = sand.u32 1, %s599_s21  }
 0x23a   : > { %s410_s26 = scalar_lea.sflag [#allocation3], %s409_s19 }
 0x23b   : > { %p508_p2 = pnand %p511_p1, %p694_p6 }
 0x23d   : > { %594 = dma.done.wait (!%p508_p2), %s410_s26, 128  }
 0x23e   : > { %596 = vsyncadd (!%p508_p2), %s410_s26, 4294967168  ;;  %p16_p3 = scmp.ge.s32.totalorder %s677_s27, 4   ;;  %s789_s21 = smov %s603_s22 }
 0x23f   : > { %s790_s22 = smov %s607_s23  ;;  %s791_s23 = smov %s688_s30 }
 0x240   : > { %s792_s24 = smov %s677_s27  ;;  %18 = sbr.rel (!%p16_p3) target bundleno = 3 (0x3), region = 82 }
 0x247   :  { %415 = vsyncpa [#allocation3], 1 }
 0x248   :  { %417 = vsyncpa [#allocation3 + $0x1], 1 }

// kernel: multi_head_attention.3
= control target key start
LH: loop header
LB: loop body
LE: loop exit
PB: predicated region body
PF: predicated region fallthrough
CT: control target
= control target key end

     0   :  { %s1002_s17 = smov 0   ;;  %s1093_s0 = inlined_call_operand.vmem [shape: f32[16,32], index: 0, kind: input, shape index: {}]   ;;  %s1094_s1 = inlined_call_operand.vmem [shape: f32[16,32], index: 1, kind: input, shape index: {}]   ;;  %s1095_s2 = inlined_call_operand.vmem [shape: f32[16,32], index: 2, kind: input, shape index: {}]   ;;  %s1096_s3 = inlined_call_operand.vmem [shape: f32[32,32], index: 3, kind: input, shape index: {}]   ;;  %s1097_s4 = inlined_call_operand.vmem [shape: f32[32,32], index: 4, kind: input, shape index: {}]   ;;  %s1098_s5 = inlined_call_operand.vmem [shape: f32[32,32], index: 5, kind: input, shape index: {}]   ;;  %s1099_s6 = inlined_call_operand.vmem [shape: f32[1,32], index: 6, kind: input, shape index: {}]   ;;  %s1100_s7 = inlined_call_operand.vmem [shape: f32[1,32], index: 7, kind: input, shape index: {}]   ;;  %s1101_s8 = inlined_call_operand.vmem [shape: f32[1,32], index: 8, kind: input, shape index: {}]   ;;  %s1102_s9 = inlined_call_operand.vmem [shape: f32[16,32], index: 9, kind: output, shape index: {0}]   ;;  %s1103_s10 = inlined_call_operand.vmem [shape: f32[16,32], index: 10, kind: output, shape index: {1}]   ;;  %s1104_s11 = inlined_call_operand.vmem [shape: f32[16,32], index: 11, kind: output, shape index: {2}]  }
   0x1 LB: > { %s835_s18 = sadd.s32 4294967295, %s937_s17   ;;  %p839_p0 = scmp.ge.s32.totalorder %s937_s17, 1  ;;  %s937_s17 = sphi %s1002_s17, %s22_s17  }
   0x2   : > { %p359_p1 = scmp.lt.s32.totalorder %s937_s17, 3 }
   0x4   : > { %p360_p2 = pnand %p839_p0, %p359_p1 }
   0x5   : > { %v438_v0 = vld [vmem:[%s1096_s3] sm:$0xff] (!%p360_p2)  ;;  %v439_v1 = vld [vmem:[%s1096_s3 + $0x8] sm:$0xff] (!%p360_p2)  ;;  %v440_v2 = vld [vmem:[%s1096_s3 + $0x10] sm:$0xff] (!%p360_p2)  ;;  %v939_v3 = vmov (!%p360_p2), 0.0|0.0   ;;  %vm940_vm0 = vmmov (!%p360_p2), 0   ;;  %v941_v6 = vmov (!%p360_p2), 0.0  }
   0x6   : > { %363 = sbr.rel (%p360_p2) target bundleno = 240 (0xf0), region = 56  ;;  %902 = vmatprep.subr.bf16.mxu0 (!%p360_p2), %v939_v3  ;;  %v903_v4 = vpack.c.bf16 (!%p360_p2), %v439_v1, %v438_v0  ;;  %v441_v5 = vld [vmem:[%s1096_s3 + $0x18] sm:$0xff] (!%p360_p2)  ;;  %877 = vmatprep.mubr.msk.f32.mxu0 (!%p360_p2), %vm940_vm0, %v941_v6  ;;  %p413_p3 = scmp.lt.s32.totalorder (!%p360_p2), %s835_s18, 1  ;;  %v525_v7 = vld [vmem:[%s1097_s4] sm:$0xff] (!%p360_p2)  ;;  %v526_v8 = vld [vmem:[%s1097_s4 + $0x8] sm:$0xff] (!%p360_p2)  ;;  %vm449_vm1 = vcmask (!%p360_p2), 261120  }
   0x7   : > { %908 = vmatprep.subr.bf16.mxu1 (!%p360_p2), %v939_v3  ;;  %v909_v9 = vpack.c.bf16 (!%p360_p2), %v526_v8, %v525_v7  ;;  %v527_v10 = vld [vmem:[%s1097_s4 + $0x10] sm:$0xff] (!%p360_p2)  ;;  %888 = vmatprep.mubr.msk.f32.mxu1 (!%p360_p2), %vm940_vm0, %v941_v6  ;;  %v906_v11 = vpack.c.bf16 (!%p360_p2), %v441_v5, %v440_v2  ;;  %v528_v12 = vld [vmem:[%s1097_s4 + $0x18] sm:$0xff] (!%p360_p2)  ;;  %v611_v13 = vld [vmem:[%s1098_s5] sm:$0xff] (!%p360_p2) }
   0x8   : > { %904 = vmatpush3.bf16.msra.mxu0 (!%p360_p2), %v903_v4  ;;  %v612_v14 = vld [vmem:[%s1098_s5 + $0x8] sm:$0xff] (!%p360_p2)  ;;  %v912_v15 = vpack.c.bf16 (!%p360_p2), %v528_v12, %v527_v10  ;;  %v613_v18 = vld [vmem:[%s1098_s5 + $0x10] sm:$0xff] (!%p360_p2)  ;;  %v614_v19 = vld [vmem:[%s1098_s5 + $0x18] sm:$0xff] (!%p360_p2) }
   0x9   : > { %905 = vmatprep.subr.bf16.mxu0 (!%p360_p2), %v939_v3  ;;  %910 = vmatpush3.bf16.msra.mxu1 (!%p360_p2), %v909_v9  ;;  %v915_v17 = vpack.c.bf16 (!%p360_p2), %v612_v14, %v611_v13  ;;  %v918_v21 = vpack.c.bf16 (!%p360_p2), %v614_v19, %v613_v18  ;;  %v846_v23 = vld [vmem:[%s1099_s6] ss:$0 sm:$0xff] (!%p360_p2) }
   0xa   : > { %911 = vmatprep.subr.bf16.mxu1 (!%p360_p2), %v939_v3  ;;  %v848_v24 = vld [vmem:[%s1100_s7] ss:$0 sm:$0xff] (!%p360_p2) }
   0xb   : > { %v850_v31 = vld [vmem:[%s1101_s8] ss:$0 sm:$0xff] (!%p360_p2) }
   0xc   : > { %907 = vmatpush3.bf16.msra.mxu0 (!%p360_p2), %v906_v11 }
   0xd   : > { %s1106_s18 = smov (!%p413_p3, %s835_s18), 1  ;;  %914 = vmatprep.subr.bf16.mxu0 %v939_v3  ;;  %913 = vmatpush3.bf16.msra.mxu1 %v912_v15 }
   0xe   : > { %s1042_s22 = sshll.u32 %s1106_s18, 3 }
   0xf   : > { %s416_s25 = scalar_lea.vmem %s1093_s0, %s1042_s22  ;;  %s420_s28 = scalar_lea.vmem %s1094_s1, %s1042_s22 }
  0x10   : > { %v437_v16 = vld [vmem:[%s416_s25] sm:$0xff]  ;;  %s424_s15 = scalar_lea.vmem %s1095_s2, %s1042_s22  ;;  %s428_s25 = scalar_lea.vmem %s1102_s9, %s1042_s22 }
  0x11   : > { %v524_v20 = vld [vmem:[%s420_s28] sm:$0xff]  ;;  %878 = vmatmul.mubr.msk.f32.vlgmr.msra.gmra.mrb[0].mxu0 %vm449_vm1, %v437_v16  ;;  %s432_s28 = scalar_lea.vmem %s1103_s10, %s1042_s22  ;;  %s436_s13 = scalar_lea.vmem %s1104_s11, %s1042_s22 }
  0x12   : > { %916 = vmatpush3.bf16.msra.mxu0 %v915_v17  ;;  %889 = vmatmul.mubr.msk.f32.vlgmr.msra.gmra.mrb[0].mxu1 %vm449_vm1, %v524_v20  ;;  %v610_v22 = vld [vmem:[%s424_s15] sm:$0xff] }
  0x13   : > { %917 = vmatprep.subr.bf16.mxu0 %v939_v3  ;;  %899 = vmatprep.mubr.msk.f32.mxu0 %vm940_vm0, %v941_v6 }
  0x16   : > { %919 = vmatpush3.bf16.msra.mxu0 %v918_v21 }
  0x19   : > { %900 = vmatmul.mubr.msk.f32.vlgmr.msra.gmra.mrb[2].mxu0 %vm449_vm1, %v610_v22 }
  0xe4   : > { %v519_v25 = vpop.f32.mrb[0].mxu0 }
  0xe5   : > { %v520_v26 = vadd.f32 %v846_v23, %v519_v25  ;;  %v879_v27 = vpop.f32.mrb[1].mxu0  ;;  %v605_v28 = vpop.f32.mrb[0].mxu1 }
  0xe6   : > { %v606_v29 = vadd.f32 %v848_v24, %v605_v28  ;;  %v890_v30 = vpop.f32.mrb[1].mxu1 }
  0xe7   : > { %523 = vst.msk [vmem:[%s428_s25] sm:$0xff] %vm449_vm1, %v520_v26 }
  0xe8   : > { %609 = vst.msk [vmem:[%s432_s28] sm:$0xff] %vm449_vm1, %v606_v29 }
  0xec   : > { %v691_v32 = vpop.f32.mrb[2].mxu0 }
  0xed   : > { %v692_v33 = vadd.f32 %v850_v31, %v691_v32  ;;  %v901_v34 = vpop.f32.mrb[3].mxu0 }
  0xef   : > { %695 = vst.msk [vmem:[%s436_s13] sm:$0xff] %vm449_vm1, %v692_v33 }
  0xf0 PF: > { %s22_s17 = sadd.s32 1, %s937_s17  }
  0xf1   : > { %p19_p4 = scmp.ge.s32.totalorder %s22_s17, 4  }
  0xf3   :  { %21 = sbr.rel (!%p19_p4) target bundleno = 1 (0x1), region = 116 }

// kernel: multi_head_attention.4
= control target key start
LH: loop header
LB: loop body
LE: loop exit
PB: predicated region body
PF: predicated region fallthrough
CT: control target
= control target key end

     0   :  { %10 = vsyncpa [#allocation3], 0  ;;  %s1571_s0 = inlined_call_operand.vmem [shape: f32[8,8,8], index: 0, kind: input, shape index: {}]   ;;  %s1572_s1 = inlined_call_operand.vmem [shape: f32[8,8,8], index: 1, kind: input, shape index: {}]   ;;  %s1573_s2 = inlined_call_operand.vmem [shape: f32[8,8,8], index: 2, kind: input, shape index: {}]   ;;  %s1574_s3 = inlined_call_operand.vmem [shape: f32[8,8,8], index: 3, kind: output, shape index: {0}]   ;;  %s1575_s4 = inlined_call_operand.hbm [shape: f32[8,8,8], index: 4, kind: output, shape index: {1}]  }
   0x1   :  { %12 = vsyncpa [#allocation3 + $0x1], 0  ;;  %s1386_s15 = smov 0   ;;  %s1388_s16 = smov 0  }
   0x2   :  { %s1390_s17 = smov 0   ;;  %s1392_s18 = smov 0  }
   0x3   :  { %s1394_s19 = smov 0   ;;  %s1396_s20 = smov 0  }
   0x4 LB: > { %s1113_s21 = sadd.s32 4294967295, %s1354_s20   ;;  %s1114_s22 = sadd.s32 4294967294, %s1354_s20   ;;  %s1354_s20 = sphi %s1396_s20, %s18_s20   ;;  %s1350_s19 = sphi %s1394_s19, %s1582_s19   ;;  %s1346_s18 = sphi %s1392_s18, %s1581_s18   ;;  %s1342_s17 = sphi %s1390_s17, %s1580_s17   ;;  %s1338_s16 = sphi %s1388_s16, %s1579_s16   ;;  %s1334_s15 = sphi %s1386_s15, %s1578_s15  }
   0x5   : > { %s30_s23 = sadd.s32 1, %s1350_s19  ;;  %s147_s24 = sadd.s32 1, %s1342_s17 }
   0x6   : > { %p32_p0 = scmp.ge.s32.totalorder %s30_s23, 2  ;;  %p157_p1 = scmp.ne.s32.totalorder %s1342_s17, %s1338_s16 }
   0x7   : > { %p158_p2 = scmp.eq.s32.totalorder %s1113_s21, 1  ;;  %p163_p3 = scmp.ne.s32.totalorder %s1338_s16, %s1334_s15 }
   0x8   : > { %s1584_s23 = smov (%p32_p0, %s30_s23), 0  ;;  %p164_p5 = scmp.eq.s32.totalorder %s1114_s22, 1 }
   0x9   : > { %p1426_p4 = por %p158_p2, %p157_p1  ;;  %s142_s26 = ssub.s32 %s1350_s19, %s1584_s23 }
   0xa   : > { %p1117_p6 = scmp.ge.s32.totalorder %s1354_s20, 1  ;;  %p145_p7 = scmp.eq.s32.totalorder %s142_s26, 0 }
   0xb   : > { %p1433_p8 = por %p164_p5, %p163_p3  ;;  %p212_p9 = scmp.lt.s32.totalorder %s1354_s20, 3 }
   0xc   : > { %s1439_s28 = scalar_select %p145_p7, %s1342_s17, %s147_s24  }
   0xd   : > { %p213_p10 = pnand %p1117_p6, %p212_p9 }
   0xe   : > { %s1119_s29 = sshll.u32 (!%p213_p10), %s1346_s18, 2  ;;  %v1356_v0 = vmov (!%p213_p10), 0.0   ;;  %vm1357_vm0 = vmmov (!%p213_p10), 0   ;;  %vm302_vm1 = vcmask (!%p213_p10), 64512   ;;  %s256_s14 = sand.u32 (!%p213_p10), 1, %s1338_s16  }
   0xf   : > { %216 = sbr.rel (%p213_p10) target bundleno = 776 (0x308), region = 32  ;;  %1161 = vmatprep.subr.mxu0 (!%p213_p10), %v1356_v0  ;;  %p260_p11 = scmp.lt.s32.totalorder (!%p213_p10), %s1119_s29, 7  ;;  %1163 = vmatprep.mubr.msk.f32.mxu0 (!%p213_p10), %vm1357_vm0, %v1356_v0 }
  0x10   : > { %1166 = vmatprep.subr.mxu1 (!%p213_p10), %v1356_v0  ;;  %1168 = vmatprep.mubr.msk.f32.mxu1 (!%p213_p10), %vm1357_vm0, %v1356_v0  ;;  %s1118_s21 = sshll.u32 (!%p213_p10), %s256_s14, 5  ;;  %s1144_s24 = sshll.u32 (!%p213_p10), %s1346_s18, 9 }
  0x11   : > { %s258_s22 = scalar_lea.vmem (!%p213_p10), [#allocation2], %s1118_s21  ;;  %s1511_s6 = scalar_lea.hbm (!%p213_p10), %s1575_s4, %s1144_s24 }
  0x12   : > { %s982_s26 = sshll.u32 (!%p213_p10), %s258_s22, 4  ;;  %s1358_s18 = smov (!%p213_p10), [#allocation2]   ;;  %s1513_s26 = int_to_ptr.vmem [resolvable:$true] %s982_s26 }
  0x13   : > { %s1276_s8 = scalar_lea.vmem (!%p213_p10), %s1513_s26, 512  ;;  %s1280_s9 = sshll.u32 (!%p213_p10), %s1358_s18, 4  ;;  %s1281_s9 = int_to_ptr.vmem [resolvable:$false] %s1280_s9 }
  0x14   : > { %p1277_p12 = scmp.ne.s32.totalorder (!%p213_p10), %s1513_s26, %s1276_s8  ;;  %p1283_p1 = scmp.lt.s32.totalorder (!%p213_p10), %s1513_s26, %s1281_s9 }
  0x16   : > { %s1586_s29 = smov (!%p260_p11, %s1119_s29), 7  ;;  %p1278_p13 = pnand %p1277_p12, %p1426_p4 }
  0x17   : > { %s1448_s30 = sshll.u32 %s1586_s29, 3 }
  0x18   : > { %s272_s7 = scalar_lea.vmem %s1572_s1, %s1448_s30  ;;  %s266_s10 = scalar_lea.vmem %s1571_s0, %s1448_s30 }
  0x19   : > { %v298_v1 = vld [vmem:[%s272_s7] sm:$0xff]  ;;  %v299_v3 = vld [vmem:[%s272_s7 + $0x8] sm:$0xff]  ;;  %v292_v6 = vld [vmem:[%s266_s10 + $0x10] sm:$0xff]  ;;  %s278_s13 = scalar_lea.vmem %s1573_s2, %s1448_s30  ;;  %p1279_p0 = pneg %p1278_p13 }
  0x1a   : > { %v290_v2 = vld [vmem:[%s266_s10] sm:$0xff]  ;;  %1162 = vmatpush3.xpose.msk.msra.mxu0 %vm302_vm1, %v298_v1  ;;  %1167 = vmatpush3.xpose.msk.msra.mxu1 %vm302_vm1, %v299_v3  ;;  %v291_v5 = vld [vmem:[%s266_s10 + $0x8] sm:$0xff]  ;;  %v300_v7 = vld [vmem:[%s272_s7 + $0x10] sm:$0xff]  ;;  %v296_v11 = vmul.f32 0.35355338, %v292_v6 }
  0x1b   : > { %v294_v4 = vmul.f32 0.35355338, %v290_v2  ;;  %1171 = vmatprep.subr.mxu0 %v1356_v0  ;;  %v295_v8 = vmul.f32 0.35355338, %v291_v5  ;;  %1176 = vmatprep.subr.mxu1 %v1356_v0  ;;  %v293_v9 = vld [vmem:[%s266_s10 + $0x18] sm:$0xff]  ;;  %v655_v45 = vld [vmem:[%s278_s13] sm:$0xff] }
  0x1c   : > { %v301_v10 = vld [vmem:[%s272_s7 + $0x18] sm:$0xff]  ;;  %v297_v12 = vmul.f32 0.35355338, %v293_v9  ;;  %v656_v46 = vld [vmem:[%s278_s13 + $0x8] sm:$0xff]  ;;  %v657_v53 = vld [vmem:[%s278_s13 + $0x10] sm:$0xff]  ;;  %s1517_s7 = scalar_lea.sflag [#allocation3], %s256_s14 }
  0x1d   : > { %1164 = vmatmul.mubr.msk.f32.vlgmr.msra.gmra.mrb[0].mxu0 %vm302_vm1, %v294_v4  ;;  %1169 = vmatmul.mubr.msk.f32.vlgmr.msra.gmra.mrb[0].mxu1 %vm302_vm1, %v295_v8  ;;  %v658_v57 = vld [vmem:[%s278_s13 + $0x18] sm:$0xff]  ;;  %s1282_s10 = scalar_lea.vmem %s1281_s9, 1024 }
  0x1e   : > { %1172 = vmatpush3.xpose.msk.msra.mxu0 %vm302_vm1, %v300_v7  ;;  %1173 = vmatprep.mubr.msk.f32.mxu0 %vm1357_vm0, %v1356_v0  ;;  %p1284_p2 = scmp.lt.s32.totalorder %s1282_s10, %s1276_s8 }
  0x1f   : > { %1177 = vmatpush3.xpose.msk.msra.mxu1 %vm302_vm1, %v301_v10  ;;  %1178 = vmatprep.mubr.msk.f32.mxu1 %vm1357_vm0, %v1356_v0 }
  0x20   : > { %1181 = vmatprep.subr.mxu0 %v1356_v0  ;;  %1186 = vmatprep.subr.mxu1 %v1356_v0  ;;  %p1285_p3 = por %p1284_p2, %p1283_p1 }
  0x21   : > { %1174 = vmatmul.mubr.msk.f32.vlgmr.msra.gmra.mrb[2].mxu0 %vm302_vm1, %v296_v11 }
  0x22   : > { %1179 = vmatmul.mubr.msk.f32.vlgmr.msra.gmra.mrb[2].mxu1 %vm302_vm1, %v297_v12  ;;  %1183 = vmatprep.mubr.msk.f32.mxu0 %vm1357_vm0, %v1356_v0  ;;  %p1286_p5 = pnand %p1285_p3, %p1279_p0 }
  0x23   : > { %1188 = vmatprep.mubr.msk.f32.mxu1 %vm1357_vm0, %v1356_v0  ;;  %1182 = vmatpush3.msra.mxu0 %v655_v45 }
  0x24   : > { %1191 = vmatprep.subr.mxu0 %v1356_v0  ;;  %1187 = vmatpush3.msra.mxu1 %v656_v46 }
  0x25   : > { %1196 = vmatprep.subr.mxu1 %v1356_v0 }
  0xf0   : > { %v375_v13 = vpop.f32.mrb[0].mxu0  ;;  %v451_v14 = vpop.f32.mrb[0].mxu1 }
  0xf1   : > { %v1165_v15 = vpop.f32.mrb[1].mxu0  ;;  %v607_v16 = vsel %vm302_vm1, %v375_v13, -inf  ;;  %v1170_v17 = vpop.f32.mrb[1].mxu1  ;;  %v610_v18 = vsel %vm302_vm1, %v451_v14, -inf }
  0xf2   : > { %608 = vmax.xlane.f32.xlu0 %v607_v16 }
  0xf4   : > { %v527_v19 = vpop.f32.mrb[2].mxu0 }
  0xf5   : > { %v1175_v20 = vpop.f32.mrb[3].mxu0  ;;  %v613_v21 = vsel %vm302_vm1, %v527_v19, -inf  ;;  %v603_v22 = vpop.f32.mrb[2].mxu1 }
  0xf6   : > { %611 = vmax.xlane.f32.xlu0 %v610_v18  ;;  %614 = vmax.xlane.f32.xlu1 %v613_v21  ;;  %v1180_v23 = vpop.f32.mrb[3].mxu1  ;;  %v616_v24 = vsel %vm302_vm1, %v603_v22, -inf }
  0xfa   : > { %617 = vmax.xlane.f32.xlu1 %v616_v24 }
 0x17f   : > { %v609_v25 = vpop.xlane.xlu0 %608 }
 0x180   : > { %v619_v26 = vsub.f32 %v375_v13, %v609_v25 }
 0x182   : > { %v623_v27 = vmul.f32 1.442695, %v619_v26 }
 0x183   : > { %v612_v28 = vpop.xlane.xlu0 %611  ;;  %v615_v29 = vpop.xlane.xlu1 %614 }
 0x184   : > { %1260 = vpow2.f32 %v623_v27  ;;  %v620_v30 = vsub.f32 %v451_v14, %v612_v28  ;;  %v621_v31 = vsub.f32 %v527_v19, %v615_v29 }
 0x186   : > { %v625_v32 = vmul.f32 1.442695, %v620_v30  ;;  %v627_v33 = vmul.f32 1.442695, %v621_v31 }
 0x187   : > { %v618_v34 = vpop.xlane.xlu1 %617 }
 0x188   : > { %1262 = vpow2.f32 %v625_v32  ;;  %v622_v35 = vsub.f32 %v603_v22, %v618_v34 }
 0x189   : > { %1264 = vpow2.f32 %v627_v33 }
 0x18a   : > { %v629_v36 = vmul.f32 1.442695, %v622_v35 }
 0x18c   : > { %1266 = vpow2.f32 %v629_v36 }
 0x18e   : > { %v1261_v37 = vpop.eup %1260 }
 0x18f   : > { %v631_v38 = vsel %vm302_vm1, %v1261_v37, 0.0 }
 0x190   : > { %632 = vadd.xlane.f32.xlu0 %v631_v38 }
 0x192   : > { %v1263_v39 = vpop.eup %1262 }
 0x193   : > { %v1265_v40 = vpop.eup %1264  ;;  %v634_v41 = vsel %vm302_vm1, %v1263_v39, 0.0 }
 0x194   : > { %635 = vadd.xlane.f32.xlu1 %v634_v41  ;;  %v637_v42 = vsel %vm302_vm1, %v1265_v40, 0.0 }
 0x195   : > { %638 = vadd.xlane.f32.xlu0 %v637_v42 }
 0x196   : > { %v1267_v43 = vpop.eup %1266 }
 0x197   : > { %v640_v44 = vsel %vm302_vm1, %v1267_v43, 0.0 }
 0x198   : > { %641 = vadd.xlane.f32.xlu1 %v640_v44 }
 0x21d   : > { %v633_v47 = vpop.xlane.xlu0 %632 }
 0x21e   : > { %1268 = vrcp.f32 %v633_v47 }
 0x221   : > { %v636_v48 = vpop.xlane.xlu1 %635 }
 0x222   : > { %v639_v49 = vpop.xlane.xlu0 %638  ;;  %1270 = vrcp.f32 %v636_v48 }
 0x223   : > { %1272 = vrcp.f32 %v639_v49 }
 0x225   : > { %v642_v50 = vpop.xlane.xlu1 %641 }
 0x226   : > { %1274 = vrcp.f32 %v642_v50 }
 0x228   : > { %v1269_v51 = vpop.eup %1268 }
 0x229   : > { %v647_v52 = vmul.f32 %v1269_v51, %v1261_v37 }
 0x22b   : > { %651 = vst.msk [vmem:[%s258_s22] sm:$0xff] %vm302_vm1, %v647_v52  ;;  %1184 = vmatmul.mubr.msk.f32.vlgmr.msra.gmra.mrb[4].mxu0 %vm302_vm1, %v647_v52 }
 0x22c   : > { %v1271_v54 = vpop.eup %1270  ;;  %1192 = vmatpush3.msra.mxu0 %v657_v53  ;;  %1193 = vmatprep.mubr.msk.f32.mxu0 %vm1357_vm0, %v1356_v0 }
 0x22d   : > { %v1273_v55 = vpop.eup %1272  ;;  %v648_v56 = vmul.f32 %v1271_v54, %v1263_v39 }
 0x22e   : > { %v649_v58 = vmul.f32 %v1273_v55, %v1265_v40 }
 0x22f   : > { %652 = vst.msk [vmem:[%s258_s22 + $0x8] sm:$0xff] %vm302_vm1, %v648_v56  ;;  %1189 = vmatmul.mubr.msk.f32.vlgmr.msra.gmra.mrb[4].mxu1 %vm302_vm1, %v648_v56 }
 0x230   : > { %v1275_v59 = vpop.eup %1274  ;;  %653 = vst.msk [vmem:[%s258_s22 + $0x10] sm:$0xff] %vm302_vm1, %v649_v58  ;;  %1194 = vmatmul.mubr.msk.f32.vlgmr.msra.gmra.mrb[6].mxu0 %vm302_vm1, %v649_v58  ;;  %1197 = vmatpush3.msra.mxu1 %v658_v57 }
 0x231   : > { %v650_v60 = vmul.f32 %v1275_v59, %v1267_v43  ;;  %1198 = vmatprep.mubr.msk.f32.mxu1 %vm1357_vm0, %v1356_v0 }
 0x233   : > { %654 = vst.msk [vmem:[%s258_s22 + $0x18] sm:$0xff] %vm302_vm1, %v650_v60  ;;  %1199 = vmatmul.mubr.msk.f32.vlgmr.msra.gmra.mrb[6].mxu1 %vm302_vm1, %v650_v60 }
 0x234   : > { %1289 = shalt.err (!%p1286_p5)
}
 0x235   : > { %s1290_s11 = scalar_lea.hbm %s1511_s6, 512  ;;  %s1294_s14 = scalar_lea.hbm %s1575_s4, 1024 }
 0x236   : > { %p1291_p6 = scmp.ne.s32.totalorder %s1511_s6, %s1290_s11  ;;  %p1295_p10 = scmp.lt.u32.totalorder %s1511_s6, %s1575_s4 }
 0x237   : > { %p1296_p11 = scmp.lt.u32.totalorder %s1294_s14, %s1290_s11  ;;  %p1298_p13 = scmp.lt.u32.totalorder %s1290_s11, %s1511_s6 }
 0x238   : > { %p1292_p7 = pnand %p1291_p6, %p1426_p4 }
 0x239   : > { %p1297_p12 = por %p1296_p11, %p1295_p10 }
 0x23a   : > { %p1293_p9 = pneg %p1292_p7 }
 0x23b   : > { %p1299_p0 = por %p1298_p13, %p1297_p12 }
 0x23d   : > { %p1300_p1 = pnand %p1299_p0, %p1293_p9 }
 0x23f   : > { %1303 = shalt.err (!%p1300_p1)
}
 0x240   : > { %s1359_s24 = smov 128   ;;  %s1360_s29 = smov 8  }
 0x241   : > { %1201 = dma.vmem_to_hbm [thread:$0]  (%p1426_p4), %s1513_s26, 512, %s1511_s6, %s1517_s7, %s1359_s24, %s1359_s24, %s1360_s29  }
 0x242   : > { %s287_s18 = scalar_lea.vmem %s1574_s3, %s1448_s30 }
 0x2fe   : > { %v728_v61 = vpop.f32.mrb[4].mxu0 }
 0x2ff   : > { %951 = vst.msk [vmem:[%s287_s18] sm:$0xff] %vm302_vm1, %v728_v61  ;;  %v1185_v62 = vpop.f32.mrb[5].mxu0 }
 0x302   : > { %v801_v63 = vpop.f32.mrb[4].mxu1 }
 0x303   : > { %952 = vst.msk [vmem:[%s287_s18 + $0x8] sm:$0xff] %vm302_vm1, %v801_v63  ;;  %v874_v0 = vpop.f32.mrb[6].mxu0  ;;  %v1190_v1 = vpop.f32.mrb[5].mxu1 }
 0x304   : > { %953 = vst.msk [vmem:[%s287_s18 + $0x10] sm:$0xff] %vm302_vm1, %v874_v0  ;;  %v1195_v2 = vpop.f32.mrb[7].mxu0 }
 0x306   : > { %v947_v3 = vpop.f32.mrb[6].mxu1 }
 0x307   : > { %954 = vst.msk [vmem:[%s287_s18 + $0x18] sm:$0xff] %vm302_vm1, %v947_v3  ;;  %v1200_v4 = vpop.f32.mrb[7].mxu1 }
 0x308 PF: > { %p1207_p4 = scmp.ge.s32.totalorder %s1354_s20, 2  ;;  %s1008_s25 = sand.u32 1, %s1334_s15  }
 0x309   : > { %s1009_s30 = scalar_lea.sflag [#allocation3], %s1008_s25 }
 0x30a   : > { %p1204_p2 = pnand %p1207_p4, %p1433_p8 }
 0x30c   : > { %1329 = dma.done.wait (!%p1204_p2), %s1009_s30, 512  }
 0x30d   : > { %1331 = vsyncadd (!%p1204_p2), %s1009_s30, 4294966784  ;;  %s18_s20 = sadd.s32 1, %s1354_s20   ;;  %s1578_s15 = smov %s1338_s16 }
 0x30e   : > { %p15_p3 = scmp.ge.s32.totalorder %s18_s20, 4   ;;  %s1579_s16 = smov %s1342_s17 }
 0x30f   : > { %s1580_s17 = smov %s1439_s28  ;;  %s1581_s18 = smov %s1350_s19 }
 0x310   : > { %s1582_s19 = smov %s1584_s23  ;;  %17 = sbr.rel (!%p15_p3) target bundleno = 4 (0x4), region = 85 }
 0x317   :  { %1014 = vsyncpa [#allocation3], 1 }
 0x318   :  { %1016 = vsyncpa [#allocation3 + $0x1], 1 }

</bundles_post_ra>
